<compile_context>
chip_gen: v5e
topology: v5e:2x2
jax: 0.10.0
libtpu: 0.0.40
codegen_flags: <defaults>
</compile_context>

<pallas_src>
import jax
import jax.numpy as jnp
from jax.experimental import pallas as pl
from jax.experimental.pallas import tpu as pltpu

_LANE = 128


def _round_up(x, m):
    return (x + m - 1) // m * m


def _sublane(itemsize):
    # Native sublane packing: f32 -> 8 rows, bf16 -> 16, int8/fp8 -> 32.
    return max(8, 32 // max(1, int(itemsize)))


def _vmem_capacity_bytes():
    try:
        return int(pltpu.get_tpu_info().vmem_capacity_bytes)
    except Exception:
        # Conservative fallback = v7x per-TensorCore VMEM.
        return 64 * 1024 * 1024


def _pick_tiles(M, K, Np, itemsize):
    """Pick the M tile and VMEM limit: balanced tiles, generation-aware budget."""
    sub = _sublane(itemsize)
    cap = _vmem_capacity_bytes()
    # ~40 MiB working set on 128-MiB parts (v5e/v6e), ~25 MiB on 64-MiB v7x.
    budget = min(40 * 1024 * 1024, int(0.40 * cap))

    # Balanced M tiles targeting <= 512 rows (bounded edge waste, no M padding).
    n_tiles = pl.cdiv(M, 512)
    tm = min(_round_up(pl.cdiv(M, n_tiles), sub), _round_up(M, sub))

    def est(tm_):
        resident = (K * Np + Np) * itemsize          # weight + bias, single copy
        per_tile = tm_ * (K + Np) * itemsize         # patches tile + out tile
        return resident + 2 * per_tile               # x2 double buffering

    while est(tm) > budget and tm > sub:
        tm = max(sub, _round_up(tm // 2, sub))

    vmem_limit = min(int(0.5 * cap), budget + 8 * 1024 * 1024)
    return tm, vmem_limit


def _patch_embed_kernel(p_ref, w_ref, b_ref, o_ref):
    # p_ref: (tm, K)  flattened-patches tile
    # w_ref: (K, Np)  resident projection weight (DMA'd once)
    # b_ref: (1, Np)  resident bias
    # o_ref: (tm, Np) output tile
    acc = jnp.dot(p_ref[...], w_ref[...], preferred_element_type=jnp.float32)
    o_ref[...] = (acc + b_ref[...].astype(jnp.float32)).astype(o_ref.dtype)


def patch_embed(x, weight, bias, kernel_size, stride, padding=(0, 0)):
    """x: (B, C, H, W) NCHW; weight: (E, C, kh, kw); bias: (E,).

    Returns (B, Hp, Wp, E)  ==  Conv2d(x).permute(0, 2, 3, 1)
    for kernel_size == stride and zero padding.
    """
    kh, kw = kernel_size
    sh, sw = stride
    assert (kh, kw) == (sh, sw) and tuple(padding) == (0, 0), (
        "patchify kernel requires kernel_size == stride and zero padding")
    B, C, H, W = x.shape
    E = weight.shape[0]
    Hp, Wp = H // kh, W // kw
    # PyTorch Conv2d floors the output size; drop trailing rows/cols if any.
    if H != Hp * kh or W != Wp * kw:
        x = x[:, :, :Hp * kh, :Wp * kw]
    M = B * Hp * Wp
    K = C * kh * kw

    # --- im2col glue (XLA): a single transpose/copy pass over the activations.
    # TODO(synk): fuse this relayout into the kernel so x is read exactly once.
    xp = x.reshape(B, C, Hp, kh, Wp, kw)
    xp = jnp.transpose(xp, (0, 2, 4, 1, 3, 5))        # (B, Hp, Wp, C, kh, kw)
    patches = xp.reshape(M, K)                        # one fused copy in XLA

    # Weight/bias relayout is tiny.  Pad the embed dim to a lane multiple only
    # when E is not already one, keeping output stores lane-dense; when
    # E % 128 == 0 (typical ViT) the kernel emits (M, E) directly, no slice.
    Np = E if E % _LANE == 0 else _round_up(E, _LANE)
    w2d = weight.reshape(E, K).T                      # (K, E), (c, kh, kw)-major
    b2d = bias.reshape(1, E)
    if Np != E:
        w2d = jnp.pad(w2d, ((0, 0), (0, Np - E)))
        b2d = jnp.pad(b2d, ((0, 0), (0, Np - E)))

    tm, vmem_limit = _pick_tiles(M, K, Np, x.dtype.itemsize)
    grid = (pl.cdiv(M, tm),)                          # masked edge block if tm∤M

    out_flat = pl.pallas_call(
        _patch_embed_kernel,
        out_shape=jax.ShapeDtypeStruct((M, Np), x.dtype),
        grid_spec=pltpu.PrefetchScalarGridSpec(
            num_scalar_prefetch=0,
            grid=grid,
            in_specs=[
                pl.BlockSpec((tm, K), lambda i: (i, 0)),   # patches tile
                pl.BlockSpec((K, Np), lambda i: (0, 0)),   # resident weight
                pl.BlockSpec((1, Np), lambda i: (0, 0)),   # resident bias
            ],
            out_specs=pl.BlockSpec((tm, Np), lambda i: (i, 0)),
        ),
        compiler_params=pltpu.CompilerParams(
            dimension_semantics=("parallel",),             # M tiles shard across TCs
            vmem_limit_bytes=vmem_limit,
        ),
    )(patches, w2d, b2d)

    if Np != E:
        out_flat = out_flat[:, :E]
    return out_flat.reshape(B, Hp, Wp, E)


if __name__ == "__main__":
    # Small shapes consistent with the module:
    #   in_chans=4, embed_dim=32, kernel=stride=(4,4), input (2, 4, 16, 16).
    B, C, H, W = 2, 4, 16, 16
    E = 32
    ksz = (4, 4)

    key = jax.random.PRNGKey(0)
    kx, kw_, kb = jax.random.split(key, 3)
    x = jax.random.normal(kx, (B, C, H, W), dtype=jnp.float32)
    fan_in = C * ksz[0] * ksz[1]
    bound = 1.0 / (fan_in ** 0.5)
    weight = jax.random.uniform(kw_, (E, C, ksz[0], ksz[1]),
                                minval=-bound, maxval=bound, dtype=jnp.float32)
    bias = jax.random.uniform(kb, (E,), minval=-bound, maxval=bound,
                              dtype=jnp.float32)

    out = patch_embed(x, weight, bias, kernel_size=ksz, stride=ksz)
    out = jax.block_until_ready(out)

    # Reference: plain JAX conv (NCHW) + permute, to verify exact semantics.
    ref = jax.lax.conv_general_dilated(
        x, weight, window_strides=ksz, padding="VALID",
        dimension_numbers=("NCHW", "OIHW", "NCHW"))
    ref = jnp.transpose(ref + bias.reshape(1, E, 1, 1), (0, 2, 3, 1))

    assert out.shape == (B, H // ksz[0], W // ksz[1], E)
    assert jnp.allclose(out, ref, atol=1e-4, rtol=1e-4)
    print("KERNEL_OK")
</pallas_src>

<mosaic_0001>
module attributes {stable_mosaic.version = 11 : i64} {
  func.func @_patch_embed_kernel(%arg0: i32, %arg1: memref<32x64xf32, #tpu.memory_space<vmem>>, %arg2: memref<64x128xf32, #tpu.memory_space<vmem>>, %arg3: memref<1x128xf32, #tpu.memory_space<vmem>>, %arg4: memref<32x128xf32, #tpu.memory_space<vmem>>) attributes {dimension_semantics = [#tpu.dimension_semantics<parallel>], iteration_bounds = array<i64: 1>, scalar_prefetch = 0 : i64, scratch_operands = 0 : i64, tpu.core_type = #tpu.core_type<tc>, window_params = [{transform_indices = @transform_0, window_bounds = array<i64: 32, 64>}, {pipeline_mode = #tpu.pipeline_mode<synchronous>, transform_indices = @transform_1, window_bounds = array<i64: 64, 128>}, {pipeline_mode = #tpu.pipeline_mode<synchronous>, transform_indices = @transform_2, window_bounds = array<i64: 1, 128>}, {transform_indices = @transform_3, window_bounds = array<i64: 32, 128>}]} {
    %c0 = arith.constant 0 : index
    %c0_0 = arith.constant 0 : index
    %0 = vector.load %arg1[%c0, %c0_0] : memref<32x64xf32, #tpu.memory_space<vmem>>, vector<32x64xf32>
    %c0_1 = arith.constant 0 : index
    %c0_2 = arith.constant 0 : index
    %1 = vector.load %arg2[%c0_1, %c0_2] : memref<64x128xf32, #tpu.memory_space<vmem>>, vector<64x128xf32>
    %cst = arith.constant dense<0.000000e+00> : vector<32x128xf32>
    %2 = tpu.matmul %0, %1, %cst {dimension_numbers = #tpu.dot_dimension_numbers<[1], [0], [0], [1], [0, 0, 1, 1], [], []>} : vector<32x64xf32>, vector<64x128xf32>, vector<32x128xf32> -> vector<32x128xf32>
    %c0_3 = arith.constant 0 : index
    %c0_4 = arith.constant 0 : index
    %3 = vector.load %arg3[%c0_3, %c0_4] : memref<1x128xf32, #tpu.memory_space<vmem>>, vector<1x128xf32>
    %4 = vector.broadcast %3 : vector<1x128xf32> to vector<32x128xf32>
    %5 = arith.addf %2, %4 : vector<32x128xf32>
    %c0_5 = arith.constant 0 : index
    %c0_6 = arith.constant 0 : index
    %6 = vector.load %arg4[%c0_5, %c0_6] : memref<32x128xf32, #tpu.memory_space<vmem>>, vector<32x128xf32>
    tpu.vector_store %arg4[%c0_5, %c0_6], %5 {strides = array<i32>} : memref<32x128xf32, #tpu.memory_space<vmem>>, vector<32x128xf32>,
    return
  }
  func.func @transform_0(%arg0: i32) -> (i32, i32) {
    %c0_i32 = arith.constant 0 : i32
    %c0_i32_0 = arith.constant 0 : i32
    return %arg0, %c0_i32 : i32, i32
  }
  func.func @transform_1(%arg0: i32) -> (i32, i32) {
    %c0_i32 = arith.constant 0 : i32
    %c0_i32_0 = arith.constant 0 : i32
    %c0_i32_1 = arith.constant 0 : i32
    return %c0_i32, %c0_i32_0 : i32, i32
  }
  func.func @transform_2(%arg0: i32) -> (i32, i32) {
    %c0_i32 = arith.constant 0 : i32
    %c0_i32_0 = arith.constant 0 : i32
    %c0_i32_1 = arith.constant 0 : i32
    return %c0_i32, %c0_i32_0 : i32, i32
  }
  func.func @transform_3(%arg0: i32) -> (i32, i32) {
    %c0_i32 = arith.constant 0 : i32
    %c0_i32_0 = arith.constant 0 : i32
    return %arg0, %c0_i32 : i32, i32
  }
}

</mosaic_0001>

<bundles_post_ra>
// kernel: tpu_custom_call.1
= control target key start
LH: loop header
LB: loop body
LE: loop exit
PB: predicated region body
PF: predicated region fallthrough
CT: control target
= control target key end

     0   :  { %8 = vsyncpa [#allocation3], 0  ;;  %s287_s0 = inlined_call_operand.hbm [shape: f32[32,64], index: 0, kind: input, shape index: {}]   ;;  %s288_s1 = inlined_call_operand.hbm [shape: f32[64,128], index: 1, kind: input, shape index: {}]   ;;  %s289_s2 = inlined_call_operand.vmem [shape: f32[1,128], index: 2, kind: input, shape index: {}]   ;;  %s290_s3 = inlined_call_operand.hbm [shape: f32[32,128], index: 3, kind: output, shape index: {}]  }
   0x1   :  { %9 = vsyncpa [#allocation6], 0 }
   0x2   :  { %10 = vsyncpa [#allocation4], 0  ;;  %s15_s14 = sshll.u32 %s287_s0, 4  ;;  %s241_s15 = smov [#allocation2]   ;;  %s16_s14 = int_to_ptr.hbm [resolvable:$true] %s15_s14 }
   0x3   :  { %s17_s16 = sshll.u32 %s241_s15, 4  ;;  %s28_s19 = sshll.u32 %s288_s1, 4  ;;  %s18_s16 = int_to_ptr.vmem [resolvable:$true] %s17_s16  ;;  %s29_s19 = int_to_ptr.hbm [resolvable:$true] %s28_s19 }
   0x4   :  { %s242_s20 = smov 128   ;;  %s243_s21 = smov 8  }
   0x5   :  { %23 = dma.hbm_to_vmem [thread:$0]  %s16_s14, 512, %s18_s16, [#allocation3], %s242_s20, %s242_s20, %s243_s21  }
   0x6   :  { %s244_s22 = smov [#allocation5]  }
   0x7   :  { %s30_s23 = sshll.u32 %s244_s22, 4  ;;  %s31_s23 = int_to_ptr.vmem [resolvable:$true] %s30_s23 }
   0x8   :  { %36 = dma.hbm_to_vmem [thread:$0]  %s29_s19, 1024, %s31_s23, [#allocation6], %s242_s20, %s242_s20, %s243_s21  }
   0x9   :  { %235 = dma.done.wait [#allocation3], 512  }
   0xa   :  { %236 = vsyncadd [#allocation3], 4294966784 }
   0xb   :  { %237 = dma.done.wait [#allocation6], 1024  }
   0xc   :  { %238 = vsyncadd [#allocation6], 4294966272  ;;  %v58_v0 = vld [vmem:[#allocation5 + $0x38] sm:$0xff]  ;;  %v57_v1 = vld [vmem:[#allocation5 + $0x30] sm:$0xff]  ;;  %vm63_vm0 = vcmask 523264   ;;  %s245_s24 = smov [#allocation7]  }
   0xd   :  { %134 = vmatpush.msra.mxu2 %v58_v0  ;;  %135 = vmatpush.msra.mxu3 %v58_v0  ;;  %v56_v2 = vld [vmem:[#allocation5 + $0x28] sm:$0xff]  ;;  %v55_v3 = vld [vmem:[#allocation5 + $0x20] sm:$0xff]  ;;  %v54_v4 = vld [vmem:[#allocation5 + $0x18] sm:$0xff]  ;;  %s113_s25 = sshll.u32 %s245_s24, 4  ;;  %s115_s28 = sshll.u32 %s290_s3, 4  ;;  %s114_s25 = int_to_ptr.vmem [resolvable:$true] %s113_s25  ;;  %s116_s28 = int_to_ptr.hbm [resolvable:$true] %s115_s28 }
   0xe   :  { %84 = vmatpush.msra.mxu0 %v58_v0  ;;  %133 = vmatpush.msra.mxu1 %v58_v0  ;;  %v53_v5 = vld [vmem:[#allocation5 + $0x10] sm:$0xff]  ;;  %v52_v6 = vld [vmem:[#allocation5 + $0x8] sm:$0xff]  ;;  %v51_v7 = vld [vmem:[#allocation5] sm:$0xff] }
   0xf   :  { %137 = vmatpush.msra.mxu2 %v57_v1  ;;  %138 = vmatpush.msra.mxu3 %v57_v1  ;;  %v49_v8 = vld [vmem:[#allocation2 + $0x10] sm:$0xff]  ;;  %v50_v9 = vld [vmem:[#allocation2 + $0x18] sm:$0xff]  ;;  %v47_v10 = vld [vmem:[#allocation2] sm:$0xff] }
  0x10   :  { %85 = vmatpush.msra.mxu0 %v57_v1  ;;  %136 = vmatpush.msra.mxu1 %v57_v1  ;;  %v48_v11 = vld [vmem:[#allocation2 + $0x8] sm:$0xff]  ;;  %v162_v12 = vld [vmem:[%s289_s2] ss:$0 sm:$0xff] }
  0x11   :  { %140 = vmatpush.msra.mxu2 %v56_v2  ;;  %141 = vmatpush.msra.mxu3 %v56_v2 }
  0x12   :  { %86 = vmatpush.msra.mxu0 %v56_v2  ;;  %139 = vmatpush.msra.mxu1 %v56_v2 }
  0x13   :  { %143 = vmatpush.msra.mxu2 %v55_v3  ;;  %144 = vmatpush.msra.mxu3 %v55_v3 }
  0x14   :  { %87 = vmatpush.msra.mxu0 %v55_v3  ;;  %142 = vmatpush.msra.mxu1 %v55_v3 }
  0x15   :  { %146 = vmatpush.msra.mxu2 %v54_v4  ;;  %147 = vmatpush.msra.mxu3 %v54_v4 }
  0x16   :  { %88 = vmatpush.msra.mxu0 %v54_v4  ;;  %145 = vmatpush.msra.mxu1 %v54_v4 }
  0x17   :  { %149 = vmatpush.msra.mxu2 %v53_v5  ;;  %150 = vmatpush.msra.mxu3 %v53_v5 }
  0x18   :  { %89 = vmatpush.msra.mxu0 %v53_v5  ;;  %148 = vmatpush.msra.mxu1 %v53_v5 }
  0x19   :  { %152 = vmatpush.msra.mxu2 %v52_v6  ;;  %153 = vmatpush.msra.mxu3 %v52_v6 }
  0x1a   :  { %90 = vmatpush.msra.mxu0 %v52_v6  ;;  %151 = vmatpush.msra.mxu1 %v52_v6 }
  0x1b   :  { %155 = vmatpush.msra.mxu2 %v51_v7  ;;  %156 = vmatpush.msra.mxu3 %v51_v7 }
  0x1c   :  { %131 = vmatmul.msk.f32.vlgmr.msra.gmra.mxu2 %vm63_vm0, %v49_v8  ;;  %132 = vmatmul.msk.f32.vlgmr.msra.gmra.mxu3 %vm63_vm0, %v50_v9 }
  0x1d   :  { %91 = vmatpush.msra.mxu0 %v51_v7  ;;  %154 = vmatpush.msra.mxu1 %v51_v7 }
  0x1e   :  { %129 = vmatmul.msk.f32.vlgmr.msra.gmra.mxu0 %vm63_vm0, %v47_v10  ;;  %130 = vmatmul.msk.f32.vlgmr.msra.gmra.mxu1 %vm63_vm0, %v48_v11 }
  0x9b   :  { %v93_v13 = vpop.f32.mrf.mxu0  ;;  %v96_v14 = vpop.f32.mrf.mxu1 }
  0x9c   :  { %v94_v15 = vadd.f32 %v162_v12, %v93_v13  ;;  %v97_v16 = vadd.f32 %v162_v12, %v96_v14 }
  0x9e   :  { %105 = vst [vmem:[#allocation7] sm:$0xff] %v94_v15 }
  0x9f   :  { %106 = vst [vmem:[#allocation7 + $0x8] sm:$0xff] %v97_v16  ;;  %v99_v17 = vpop.f32.mrf.mxu2  ;;  %v102_v18 = vpop.f32.mrf.mxu3 }
  0xa0   :  { %v100_v19 = vadd.f32 %v162_v12, %v99_v17  ;;  %v103_v20 = vadd.f32 %v162_v12, %v102_v18 }
  0xa2   :  { %107 = vst [vmem:[#allocation7 + $0x10] sm:$0xff] %v100_v19 }
  0xa3   :  { %108 = vst [vmem:[#allocation7 + $0x18] sm:$0xff] %v103_v20 }
  0xa4   :  { %121 = dma.vmem_to_hbm [thread:$0]  %s114_s25, 512, %s116_s28, [#allocation4], %s242_s20, %s242_s20, %s243_s21  }
  0xa5   :  { %239 = dma.done.wait [#allocation4], 512  }
  0xa6   :  { %240 = vsyncadd [#allocation4], 4294966784 }
  0xa7   :  { %126 = vsyncpa [#allocation3], 1 }
  0xa8   :  { %127 = vsyncpa [#allocation6], 1 }
  0xa9   :  { %128 = vsyncpa [#allocation4], 1 }

</bundles_post_ra>
